<compile_context>
chip_gen: v7x
topology: tpu7x:2x2x1
jax: 0.10.0
libtpu: 0.0.40
codegen_flags: <defaults>
</compile_context>

<pallas_src>
import functools

import jax
import jax.numpy as jnp
from jax.experimental import pallas as pl
from jax.experimental.pallas import tpu as pltpu

LANE = 128          # vreg lane width; layer-output padding target
MAX_TILE_M = 1024   # cap on the batch tile (large-batch roofline sweet spot)


def _round_up(x, m):
    return (x + m - 1) // m * m


def _mlp_kernel(num_hidden_layers, x_ref, *refs):
    """Fused MLP for one batch tile.

    refs = (w1, b1, ..., wN, bN, w_out, b_out, out_ref)
    Weights are bf16 (in, out_pad); biases are f32 (1, out_pad);
    accumulation is f32; bias-add / ReLU run in f32 on the VPU.
    """
    out_ref = refs[-1]
    p = refs[:-1]

    h = x_ref[...].astype(jnp.bfloat16)

    # Hidden layers: Linear + ReLU
    for i in range(num_hidden_layers):
        w = p[2 * i][...]                        # (in, out_pad) bf16
        b = p[2 * i + 1][...]                    # (1, out_pad) f32
        acc = jnp.dot(h, w, preferred_element_type=jnp.float32)
        acc = jnp.maximum(acc + b, 0.0)          # f32 bias add + ReLU
        h = acc.astype(jnp.bfloat16)

    # Output layer: Linear (no activation), lane-dense (128-padded) store.
    w_out = p[2 * num_hidden_layers][...]
    b_out = p[2 * num_hidden_layers + 1][...]
    y = jnp.dot(h, w_out, preferred_element_type=jnp.float32) + b_out
    out_ref[...] = y.astype(out_ref.dtype)


def prepare_params(params):
    """One-time (hoisted) padding + bf16 cast of the MLP parameters.

    params: list of (W, b); W is (in, out) f32, b is (out,) f32. Last entry is
            the fc_out layer. Returns (flat_params, pdims, out_dim) where only
            layer *output* dims are padded to 128 and the first layer's input
            dim (latent_dim) is left unpadded.
    """
    latent_dim = params[0][0].shape[0]
    dims = [latent_dim] + [w.shape[1] for w, _ in params]
    pdims = [latent_dim] + [_round_up(d, LANE) for d in dims[1:]]

    flat_params = []
    for li, (w, b) in enumerate(params):
        in_d, out_d = w.shape
        w_p = jnp.zeros((pdims[li], pdims[li + 1]), jnp.float32)
        w_p = w_p.at[:in_d, :out_d].set(w).astype(jnp.bfloat16)
        b_p = jnp.zeros((1, pdims[li + 1]), jnp.float32).at[0, :out_d].set(b)
        flat_params += [w_p, b_p]
    return flat_params, pdims, dims[-1]


def task_decoder_forward(latent_state, prepared, *, max_tile_m=MAX_TILE_M):
    """Run the fused MLP Pallas kernel.

    latent_state: (batch, latent_dim) float32 (unpadded).
    prepared: output of prepare_params(params) (call once, reuse every step).
    """
    flat_params, pdims, out_dim = prepared
    batch, latent_dim = latent_state.shape
    assert latent_dim == pdims[0], (latent_dim, pdims[0])
    num_hidden_layers = len(flat_params) // 2 - 1

    # Single grid step for small/medium batches; <=1024-row tiles otherwise.
    tile_m = min(_round_up(batch, 8), max_tile_m)
    grid = (pl.cdiv(batch, tile_m),)

    # Activations stream per-tile; weights/biases are full-array blocks with a
    # constant index_map so they stay resident in VMEM across the whole grid.
    in_specs = [pl.BlockSpec((tile_m, latent_dim), lambda i: (i, 0))]
    for arr in flat_params:
        in_specs.append(pl.BlockSpec(arr.shape, lambda i: (0, 0)))
    out_spec = pl.BlockSpec((tile_m, pdims[-1]), lambda i: (i, 0))

    # Advisory cost estimate for XLA's scheduler.
    flops = sum(2 * batch * pdims[i] * pdims[i + 1] for i in range(len(pdims) - 1))
    bytes_accessed = (
        latent_state.size * latent_state.dtype.itemsize
        + sum(a.size * a.dtype.itemsize for a in flat_params)
        + batch * pdims[-1] * 4)
    cost = pl.CostEstimate(flops=flops, transcendentals=0,
                           bytes_accessed=bytes_accessed)

    kernel = functools.partial(_mlp_kernel, num_hidden_layers)

    out_p = pl.pallas_call(
        kernel,
        out_shape=jax.ShapeDtypeStruct((batch, pdims[-1]), jnp.float32),
        grid=grid,
        in_specs=in_specs,
        out_specs=out_spec,
        compiler_params=pltpu.CompilerParams(
            dimension_semantics=("parallel",)),   # batch tiles are independent
        cost_estimate=cost,
    )(latent_state, *flat_params)

    # Drop only the lane padding of the output features (rows are unpadded).
    return out_p[:, :out_dim]


def init_params(key, latent_dim, layers, output_dim):
    """Deterministic init matching the module's layer shapes.

    Mirrors PyTorch nn.Linear default: U(-1/sqrt(in), 1/sqrt(in)) for W and b.
    Weights are stored transposed, as (in, out), in f32.
    """
    params = []
    dims = [latent_dim] + list(layers) + [output_dim]
    for i in range(len(dims) - 1):
        in_d, out_d = dims[i], dims[i + 1]
        key, kw, kb = jax.random.split(key, 3)
        bound = 1.0 / jnp.sqrt(float(in_d))
        w = jax.random.uniform(kw, (in_d, out_d), jnp.float32, -bound, bound)
        b = jax.random.uniform(kb, (out_d,), jnp.float32, -bound, bound)
        params.append((w, b))
    return params


def reference_forward(latent_state, params):
    """Pure-JAX f32 reference of the PyTorch forward pass."""
    h = latent_state
    for w, b in params[:-1]:
        h = jax.nn.relu(h @ w + b)
    w_out, b_out = params[-1]
    return h @ w_out + b_out


if __name__ == "__main__":
    # Module config (consistent with the constructor signature)
    layers = [64, 64]          # hidden layer sizes
    latent_dim = 32
    class_dim = 8              # unused by forward, kept for parity
    task_dim = 16
    num_tasks = 8
    pred_type = "task_id"      # -> output_dim = num_tasks
    output_dim = task_dim if pred_type == "task_description" else num_tasks

    batch = 200                # not a multiple of 128; exercises the adaptive tile

    key = jax.random.PRNGKey(0)
    key_x, key_p = jax.random.split(key)
    latent_state = jax.random.normal(key_x, (batch, latent_dim), jnp.float32)
    params = init_params(key_p, latent_dim, layers, output_dim)

    # One-time parameter preparation (hoisted out of the forward path).
    prepared = prepare_params(params)

    ref = reference_forward(latent_state, params)

    # 1) Default path: single grid step (tile_m == batch), no batch padding.
    out = task_decoder_forward(latent_state, prepared)
    out = jax.block_until_ready(out)
    assert out.shape == (batch, output_dim), out.shape
    max_err = float(jnp.max(jnp.abs(out - ref)))
    # bf16 matmul operands (f32 accumulation) => ~1e-2 level error expected.
    assert jnp.allclose(out, ref, atol=5e-2, rtol=5e-2), (
        f"mismatch vs reference (single tile), max abs err={max_err}")

    # 2) Multi-tile path with a ragged, masked last tile (validates the
    #    no-batch-padding design used for large batches).
    out2 = task_decoder_forward(latent_state, prepared, max_tile_m=64)
    out2 = jax.block_until_ready(out2)
    max_err2 = float(jnp.max(jnp.abs(out2 - ref)))
    assert jnp.allclose(out2, ref, atol=5e-2, rtol=5e-2), (
        f"mismatch vs reference (ragged tiles), max abs err={max_err2}")

    print("KERNEL_OK")
</pallas_src>

<mosaic_0001>
module attributes {stable_mosaic.version = 11 : i64} {
  func.func @_mlp_kernel(%arg0: i32, %arg1: memref<200x32xf32, #tpu.memory_space<vmem>>, %arg2: memref<32x128xbf16, #tpu.memory_space<vmem>>, %arg3: memref<1x128xf32, #tpu.memory_space<vmem>>, %arg4: memref<128x128xbf16, #tpu.memory_space<vmem>>, %arg5: memref<1x128xf32, #tpu.memory_space<vmem>>, %arg6: memref<128x128xbf16, #tpu.memory_space<vmem>>, %arg7: memref<1x128xf32, #tpu.memory_space<vmem>>, %arg8: memref<200x128xf32, #tpu.memory_space<vmem>>) attributes {dimension_semantics = [#tpu.dimension_semantics<parallel>], iteration_bounds = array<i64: 1>, scalar_prefetch = 0 : i64, scratch_operands = 0 : i64, tpu.core_type = #tpu.core_type<tc>, window_params = [{transform_indices = @transform_0, window_bounds = array<i64: 200, 32>}, {pipeline_mode = #tpu.pipeline_mode<synchronous>, transform_indices = @transform_1, window_bounds = array<i64: 32, 128>}, {pipeline_mode = #tpu.pipeline_mode<synchronous>, transform_indices = @transform_2, window_bounds = array<i64: 1, 128>}, {pipeline_mode = #tpu.pipeline_mode<synchronous>, transform_indices = @transform_3, window_bounds = array<i64: 128, 128>}, {pipeline_mode = #tpu.pipeline_mode<synchronous>, transform_indices = @transform_4, window_bounds = array<i64: 1, 128>}, {pipeline_mode = #tpu.pipeline_mode<synchronous>, transform_indices = @transform_5, window_bounds = array<i64: 128, 128>}, {pipeline_mode = #tpu.pipeline_mode<synchronous>, transform_indices = @transform_6, window_bounds = array<i64: 1, 128>}, {transform_indices = @transform_7, window_bounds = array<i64: 200, 128>}]} {
    %c0 = arith.constant 0 : index
    %c0_0 = arith.constant 0 : index
    %0 = vector.load %arg1[%c0, %c0_0] : memref<200x32xf32, #tpu.memory_space<vmem>>, vector<200x32xf32>
    %1 = arith.truncf %0 : vector<200x32xf32> to vector<200x32xbf16>
    %c0_1 = arith.constant 0 : index
    %c0_2 = arith.constant 0 : index
    %2 = vector.load %arg2[%c0_1, %c0_2] : memref<32x128xbf16, #tpu.memory_space<vmem>>, vector<32x128xbf16>
    %c0_3 = arith.constant 0 : index
    %c0_4 = arith.constant 0 : index
    %3 = vector.load %arg3[%c0_3, %c0_4] : memref<1x128xf32, #tpu.memory_space<vmem>>, vector<1x128xf32>
    %cst = arith.constant dense<0.000000e+00> : vector<200x128xf32>
    %4 = tpu.matmul %1, %2, %cst {dimension_numbers = #tpu.dot_dimension_numbers<[1], [0], [0], [1], [0, 0, 1, 1], [], []>} : vector<200x32xbf16>, vector<32x128xbf16>, vector<200x128xf32> -> vector<200x128xf32>
    %5 = vector.broadcast %3 : vector<1x128xf32> to vector<200x128xf32>
    %6 = arith.addf %4, %5 : vector<200x128xf32>
    %cst_5 = arith.constant 0.000000e+00 : f32
    %7 = vector.broadcast %cst_5 : f32 to vector<200x128xf32>
    %8 = arith.maximumf %6, %7 : vector<200x128xf32>
    %9 = arith.truncf %8 : vector<200x128xf32> to vector<200x128xbf16>
    %c0_6 = arith.constant 0 : index
    %c0_7 = arith.constant 0 : index
    %10 = vector.load %arg4[%c0_6, %c0_7] : memref<128x128xbf16, #tpu.memory_space<vmem>>, vector<128x128xbf16>
    %c0_8 = arith.constant 0 : index
    %c0_9 = arith.constant 0 : index
    %11 = vector.load %arg5[%c0_8, %c0_9] : memref<1x128xf32, #tpu.memory_space<vmem>>, vector<1x128xf32>
    %cst_10 = arith.constant dense<0.000000e+00> : vector<200x128xf32>
    %12 = tpu.matmul %9, %10, %cst_10 {dimension_numbers = #tpu.dot_dimension_numbers<[1], [0], [0], [1], [0, 0, 1, 1], [], []>} : vector<200x128xbf16>, vector<128x128xbf16>, vector<200x128xf32> -> vector<200x128xf32>
    %13 = vector.broadcast %11 : vector<1x128xf32> to vector<200x128xf32>
    %14 = arith.addf %12, %13 : vector<200x128xf32>
    %cst_11 = arith.constant 0.000000e+00 : f32
    %15 = vector.broadcast %cst_11 : f32 to vector<200x128xf32>
    %16 = arith.maximumf %14, %15 : vector<200x128xf32>
    %17 = arith.truncf %16 : vector<200x128xf32> to vector<200x128xbf16>
    %c0_12 = arith.constant 0 : index
    %c0_13 = arith.constant 0 : index
    %18 = vector.load %arg6[%c0_12, %c0_13] : memref<128x128xbf16, #tpu.memory_space<vmem>>, vector<128x128xbf16>
    %c0_14 = arith.constant 0 : index
    %c0_15 = arith.constant 0 : index
    %19 = vector.load %arg7[%c0_14, %c0_15] : memref<1x128xf32, #tpu.memory_space<vmem>>, vector<1x128xf32>
    %cst_16 = arith.constant dense<0.000000e+00> : vector<200x128xf32>
    %20 = tpu.matmul %17, %18, %cst_16 {dimension_numbers = #tpu.dot_dimension_numbers<[1], [0], [0], [1], [0, 0, 1, 1], [], []>} : vector<200x128xbf16>, vector<128x128xbf16>, vector<200x128xf32> -> vector<200x128xf32>
    %21 = vector.broadcast %19 : vector<1x128xf32> to vector<200x128xf32>
    %22 = arith.addf %20, %21 : vector<200x128xf32>
    %c0_17 = arith.constant 0 : index
    %c0_18 = arith.constant 0 : index
    %23 = vector.load %arg8[%c0_17, %c0_18] : memref<200x128xf32, #tpu.memory_space<vmem>>, vector<200x128xf32>
    tpu.vector_store %arg8[%c0_17, %c0_18], %22 {strides = array<i32>} : memref<200x128xf32, #tpu.memory_space<vmem>>, vector<200x128xf32>,
    return
  }
  func.func @transform_0(%arg0: i32) -> (i32, i32) {
    %c0_i32 = arith.constant 0 : i32
    %c0_i32_0 = arith.constant 0 : i32
    return %arg0, %c0_i32 : i32, i32
  }
  func.func @transform_1(%arg0: i32) -> (i32, i32) {
    %c0_i32 = arith.constant 0 : i32
    %c0_i32_0 = arith.constant 0 : i32
    %c0_i32_1 = arith.constant 0 : i32
    return %c0_i32, %c0_i32_0 : i32, i32
  }
  func.func @transform_2(%arg0: i32) -> (i32, i32) {
    %c0_i32 = arith.constant 0 : i32
    %c0_i32_0 = arith.constant 0 : i32
    %c0_i32_1 = arith.constant 0 : i32
    return %c0_i32, %c0_i32_0 : i32, i32
  }
  func.func @transform_3(%arg0: i32) -> (i32, i32) {
    %c0_i32 = arith.constant 0 : i32
    %c0_i32_0 = arith.constant 0 : i32
    %c0_i32_1 = arith.constant 0 : i32
    return %c0_i32, %c0_i32_0 : i32, i32
  }
  func.func @transform_4(%arg0: i32) -> (i32, i32) {
    %c0_i32 = arith.constant 0 : i32
    %c0_i32_0 = arith.constant 0 : i32
    %c0_i32_1 = arith.constant 0 : i32
    return %c0_i32, %c0_i32_0 : i32, i32
  }
  func.func @transform_5(%arg0: i32) -> (i32, i32) {
    %c0_i32 = arith.constant 0 : i32
    %c0_i32_0 = arith.constant 0 : i32
    %c0_i32_1 = arith.constant 0 : i32
    return %c0_i32, %c0_i32_0 : i32, i32
  }
  func.func @transform_6(%arg0: i32) -> (i32, i32) {
    %c0_i32 = arith.constant 0 : i32
    %c0_i32_0 = arith.constant 0 : i32
    %c0_i32_1 = arith.constant 0 : i32
    return %c0_i32, %c0_i32_0 : i32, i32
  }
  func.func @transform_7(%arg0: i32) -> (i32, i32) {
    %c0_i32 = arith.constant 0 : i32
    %c0_i32_0 = arith.constant 0 : i32
    return %arg0, %c0_i32 : i32, i32
  }
}

</mosaic_0001>

<bundles_post_ra>
// kernel: tpu_custom_call.1
= control target key start
LH: loop header
LB: loop body
LE: loop exit
PB: predicated region body
PF: predicated region fallthrough
CT: control target
= control target key end

     0   :  { %v1130_v1 = vmov 0.0   ;;  %vm1131_vm0 = vmmov 0   ;;  %vm89_vm1 = vcmask 261120   ;;  %s1526_s0 = inlined_call_operand.vmem [shape: f32[200,32], index: 0, kind: input, shape index: {}]   ;;  %s1527_s1 = inlined_call_operand.vmem [shape: bf16[32,128], index: 1, kind: input, shape index: {}]   ;;  %s1528_s2 = inlined_call_operand.vmem [shape: f32[1,128], index: 2, kind: input, shape index: {}]   ;;  %s1529_s3 = inlined_call_operand.vmem [shape: bf16[128,128], index: 3, kind: input, shape index: {}]   ;;  %s1530_s4 = inlined_call_operand.vmem [shape: f32[1,128], index: 4, kind: input, shape index: {}]   ;;  %s1531_s5 = inlined_call_operand.vmem [shape: bf16[128,128], index: 5, kind: input, shape index: {}]   ;;  %s1532_s6 = inlined_call_operand.vmem [shape: f32[1,128], index: 6, kind: input, shape index: {}]   ;;  %s1533_s7 = inlined_call_operand.hbm [shape: f32[200,128], index: 7, kind: output, shape index: {}]  }
   0x1   :  { %v1088_v0 = vld [vmem:[%s1527_s1] sm:$0xff]   ;;  %887 = vmatprep.subr.bf16.mxu0 %v1130_v1  ;;  %1079 = vmatprep.subr.bf16.mxu1 %v1130_v1  ;;  %v1089_v2 = vld [vmem:[%s1527_s1 + $0x8] sm:$0xff]   ;;  %v42_v6 = vld [vmem:[%s1526_s0 + $0x70] sm:$0xff] }
   0x2   :  { %888 = vmatpush3.bf16.msra.mxu0 %v1088_v0  ;;  %891 = vmatprep.mubr.msk.bf16.mxu0 %vm1131_vm0, %v1130_v1  ;;  %v28_v3 = vld [vmem:[%s1526_s0] sm:$0xff]  ;;  %v29_v4 = vld [vmem:[%s1526_s0 + $0x8] sm:$0xff]  ;;  %v43_v7 = vld [vmem:[%s1526_s0 + $0x78] sm:$0xff] }
   0x3   :  { %889 = vmatprep.subr.bf16.mxu0 %v1130_v1  ;;  %1081 = vmatpush3.bf16.msra.mxu1 %v1088_v0  ;;  %v53_v5 = vpack.c.bf16 %v29_v4, %v28_v3  ;;  %v60_v8 = vpack.c.bf16 %v43_v7, %v42_v6  ;;  %v30_v9 = vld [vmem:[%s1526_s0 + $0x10] sm:$0xff]  ;;  %v31_v10 = vld [vmem:[%s1526_s0 + $0x18] sm:$0xff]  ;;  %v44_v11 = vld [vmem:[%s1526_s0 + $0x80] sm:$0xff] }
   0x4   :  { %1080 = vmatprep.subr.bf16.mxu1 %v1130_v1  ;;  %919 = vmatprep.mubr.msk.bf16.mxu1 %vm1131_vm0, %v1130_v1  ;;  %v45_v12 = vld [vmem:[%s1526_s0 + $0x88] sm:$0xff]  ;;  %v1090_v13 = vld [vmem:[%s1529_s3] sm:$0xff]   ;;  %v54_v14 = vpack.c.bf16 %v31_v10, %v30_v9  ;;  %v46_v19 = vld [vmem:[%s1526_s0 + $0x90] sm:$0xff] }
   0x5   :  { %v1091_v15 = vld [vmem:[%s1529_s3 + $0x8] sm:$0xff]   ;;  %v61_v16 = vpack.c.bf16 %v45_v12, %v44_v11  ;;  %v32_v17 = vld [vmem:[%s1526_s0 + $0x20] sm:$0xff]  ;;  %v47_v20 = vld [vmem:[%s1526_s0 + $0x98] sm:$0xff] }
   0x6   :  { %890 = vmatpush3.bf16.msra.mxu0 %v1089_v2  ;;  %v33_v18 = vld [vmem:[%s1526_s0 + $0x28] sm:$0xff]  ;;  %v1092_v21 = vld [vmem:[%s1529_s3 + $0x10] sm:$0xff]   ;;  %v1093_v22 = vld [vmem:[%s1529_s3 + $0x18] sm:$0xff]   ;;  %v62_v24 = vpack.c.bf16 %v47_v20, %v46_v19 }
   0x7   :  { %1082 = vmatpush3.bf16.msra.mxu1 %v1089_v2  ;;  %1011 = vmatprep.subr.bf16.mxu0 %v1130_v1  ;;  %v55_v23 = vpack.c.bf16 %v33_v18, %v32_v17 }
   0x8   :  { %943 = vmatprep.subr.bf16.mxu1 %v1130_v1 }
   0x9   :  { %892 = vmatmul.mubr.msk.bf16.vlgmr.msra.gmra.mrb[0].mxu0 %vm89_vm1, %v53_v5 }
   0xa   :  { %895 = vmatprep.mubr.msk.bf16.mxu0 %vm1131_vm0, %v1130_v1  ;;  %920 = vmatmul.mubr.msk.bf16.vlgmr.msra.gmra.mrb[0].mxu1 %vm89_vm1, %v60_v8 }
   0xb   :  { %923 = vmatprep.mubr.msk.bf16.mxu1 %vm1131_vm0, %v1130_v1  ;;  %944 = vmatpush3.bf16.msra.mxu1 %v1090_v13 }
   0xc   :  { %945 = vmatprep.subr.bf16.mxu1 %v1130_v1 }
   0xf   :  { %946 = vmatpush3.bf16.msra.mxu1 %v1091_v15 }
  0x10   :  { %947 = vmatprep.subr.bf16.mxu1 %v1130_v1 }
  0x11   :  { %896 = vmatmul.mubr.msk.bf16.gmra.mrb[4].mxu0 %vm89_vm1, %v54_v14 }
  0x12   :  { %899 = vmatprep.mubr.msk.bf16.mxu0 %vm1131_vm0, %v1130_v1  ;;  %924 = vmatmul.mubr.msk.bf16.gmra.mrb[4].mxu1 %vm89_vm1, %v61_v16 }
  0x13   :  { %927 = vmatprep.mubr.msk.bf16.mxu1 %vm1131_vm0, %v1130_v1  ;;  %948 = vmatpush3.bf16.msra.mxu1 %v1092_v21 }
  0x14   :  { %949 = vmatprep.subr.bf16.mxu1 %v1130_v1 }
  0x15   :  { %12 = vsyncpa [#allocation3], 0  ;;  %v1094_v25 = vld [vmem:[%s1529_s3 + $0x20] sm:$0xff]   ;;  %v34_v26 = vld [vmem:[%s1526_s0 + $0x30] sm:$0xff] }
  0x16   :  { %v35_v27 = vld [vmem:[%s1526_s0 + $0x38] sm:$0xff]  ;;  %v48_v28 = vld [vmem:[%s1526_s0 + $0xa0] sm:$0xff]  ;;  %v49_v29 = vld [vmem:[%s1526_s0 + $0xa8] sm:$0xff] }
  0x17   :  { %950 = vmatpush3.bf16.msra.mxu1 %v1093_v22  ;;  %v56_v30 = vpack.c.bf16 %v35_v27, %v34_v26  ;;  %v1095_v31 = vld [vmem:[%s1529_s3 + $0x28] sm:$0xff]   ;;  %v63_v32 = vpack.c.bf16 %v49_v29, %v48_v28  ;;  %v1096_v33 = vld [vmem:[%s1529_s3 + $0x30] sm:$0xff]   ;;  %v36_v34 = vld [vmem:[%s1526_s0 + $0x40] sm:$0xff] }
  0x18   :  { %951 = vmatprep.subr.bf16.mxu1 %v1130_v1  ;;  %v37_v35 = vld [vmem:[%s1526_s0 + $0x48] sm:$0xff]  ;;  %v50_v36 = vld [vmem:[%s1526_s0 + $0xb0] sm:$0xff]  ;;  %v51_v37 = vld [vmem:[%s1526_s0 + $0xb8] sm:$0xff] }
  0x19   :  { %900 = vmatmul.mubr.msk.bf16.gmra.mrb[8].mxu0 %vm89_vm1, %v55_v23  ;;  %v57_v38 = vpack.c.bf16 %v37_v35, %v36_v34  ;;  %v64_v39 = vpack.c.bf16 %v51_v37, %v50_v36  ;;  %v38_v40 = vld [vmem:[%s1526_s0 + $0x50] sm:$0xff]  ;;  %v39_v41 = vld [vmem:[%s1526_s0 + $0x58] sm:$0xff]  ;;  %v52_v42 = vld [vmem:[%s1526_s0 + $0xc0] sm:$0xff] }
  0x1a   :  { %903 = vmatprep.mubr.msk.bf16.mxu0 %vm1131_vm0, %v1130_v1  ;;  %928 = vmatmul.mubr.msk.bf16.gmra.mrb[8].mxu1 %vm89_vm1, %v62_v24  ;;  %v58_v43 = vpack.c.bf16 %v39_v41, %v38_v40  ;;  %v65_v44 = vpack.c.bf16 %v52_v42, %v52_v42  ;;  %v40_v45 = vld [vmem:[%s1526_s0 + $0x60] sm:$0xff]  ;;  %v41_v46 = vld [vmem:[%s1526_s0 + $0x68] sm:$0xff]  ;;  %v1097_v48 = vld [vmem:[%s1529_s3 + $0x38] sm:$0xff]  }
  0x1b   :  { %931 = vmatprep.mubr.msk.bf16.mxu1 %vm1131_vm0, %v1130_v1  ;;  %952 = vmatpush3.bf16.msra.mxu1 %v1094_v25  ;;  %v59_v47 = vpack.c.bf16 %v41_v46, %v40_v45  ;;  %v1098_v49 = vld [vmem:[%s1531_s5] sm:$0xff]   ;;  %v1099_v50 = vld [vmem:[%s1531_s5 + $0x8] sm:$0xff]   ;;  %v1100_v51 = vld [vmem:[%s1531_s5 + $0x10] sm:$0xff]  }
  0x1c   :  { %953 = vmatprep.subr.bf16.mxu1 %v1130_v1  ;;  %1012 = vmatpush3.bf16.msra.mxu0 %v1098_v49  ;;  %v1101_v52 = vld [vmem:[%s1531_s5 + $0x18] sm:$0xff]   ;;  %v1102_v53 = vld [vmem:[%s1531_s5 + $0x20] sm:$0xff]   ;;  %v1103_v54 = vld [vmem:[%s1531_s5 + $0x28] sm:$0xff]  }
  0x1d   :  { %1013 = vmatprep.subr.bf16.mxu0 %v1130_v1  ;;  %v1362_v55 = vld [vmem:[%s1528_s2] ss:$0 sm:$0xff]  ;;  %v1104_v56 = vld [vmem:[%s1531_s5 + $0x30] sm:$0xff]  }
  0x1f   :  { %954 = vmatpush3.bf16.msra.mxu1 %v1095_v31 }
  0x20   :  { %955 = vmatprep.subr.bf16.mxu1 %v1130_v1  ;;  %1014 = vmatpush3.bf16.msra.mxu0 %v1099_v50 }
  0x21   :  { %904 = vmatmul.mubr.msk.bf16.gmra.mrb[12].mxu0 %vm89_vm1, %v56_v30  ;;  %1015 = vmatprep.subr.bf16.mxu0 %v1130_v1 }
  0x22   :  { %907 = vmatprep.mubr.msk.bf16.mxu0 %vm1131_vm0, %v1130_v1  ;;  %932 = vmatmul.mubr.msk.bf16.gmra.mrb[12].mxu1 %vm89_vm1, %v63_v32 }
  0x23   :  { %935 = vmatprep.mubr.msk.bf16.mxu1 %vm1131_vm0, %v1130_v1  ;;  %956 = vmatpush3.bf16.msra.mxu1 %v1096_v33 }
  0x24   :  { %957 = vmatprep.subr.bf16.mxu1 %v1130_v1  ;;  %1016 = vmatpush3.bf16.msra.mxu0 %v1100_v51 }
  0x25   :  { %1017 = vmatprep.subr.bf16.mxu0 %v1130_v1 }
  0x27   :  { %958 = vmatpush3.bf16.msra.mxu1 %v1097_v48 }
  0x28   :  { %1018 = vmatpush3.bf16.msra.mxu0 %v1101_v52 }
  0x29   :  { %908 = vmatmul.mubr.msk.bf16.gmra.mrb[16].mxu0 %vm89_vm1, %v57_v38  ;;  %1019 = vmatprep.subr.bf16.mxu0 %v1130_v1 }
  0x2a   :  { %911 = vmatprep.mubr.msk.bf16.mxu0 %vm1131_vm0, %v1130_v1  ;;  %936 = vmatmul.mubr.msk.bf16.gmra.mrb[16].mxu1 %vm89_vm1, %v64_v39 }
  0x2b   :  { %939 = vmatprep.mubr.msk.bf16.mxu1 %vm1131_vm0, %v1130_v1 }
  0x2c   :  { %1020 = vmatpush3.bf16.msra.mxu0 %v1102_v53 }
  0x2d   :  { %1021 = vmatprep.subr.bf16.mxu0 %v1130_v1 }
  0x30   :  { %1022 = vmatpush3.bf16.msra.mxu0 %v1103_v54 }
  0x31   :  { %912 = vmatmul.mubr.msk.bf16.gmra.mrb[20].mxu0 %vm89_vm1, %v58_v43  ;;  %1023 = vmatprep.subr.bf16.mxu0 %v1130_v1 }
  0x32   :  { %915 = vmatprep.mubr.msk.bf16.mxu0 %vm1131_vm0, %v1130_v1  ;;  %940 = vmatmul.mubr.msk.bf16.gmra.mrb[20].mxu1 %vm89_vm1, %v65_v44 }
  0x33   :  { %959 = vmatprep.mubr.msk.bf16.mxu1 %vm1131_vm0, %v1130_v1 }
  0x34   :  { %1024 = vmatpush3.bf16.msra.mxu0 %v1104_v56 }
  0x35   :  { %1025 = vmatprep.subr.bf16.mxu0 %v1130_v1 }
  0x39   :  { %916 = vmatmul.mubr.msk.bf16.gmra.mrb[24].mxu0 %vm89_vm1, %v59_v47 }
  0x3a   :  { %1027 = vmatprep.mubr.msk.bf16.mxu0 %vm1131_vm0, %v1130_v1 }
  0xdc   :  { %v163_v57 = vpop.f32.mrb[0].mxu0 }
  0xdd   :  { %v164_v58 = vadd.f32 %v1362_v55, %v163_v57  ;;  %v893_v59 = vpop.f32.mrb[1].mxu0  ;;  %v219_v60 = vpop.f32.mrb[0].mxu1 }
  0xde   :  { %v166_v61 = vpop.f32.mrb[2].mxu0  ;;  %v220_v62 = vadd.f32 %v1362_v55, %v219_v60  ;;  %v921_v63 = vpop.f32.mrb[1].mxu1 }
  0xdf   :  { %v167_v0 = vadd.f32 %v1362_v55, %v166_v61  ;;  %v894_v2 = vpop.f32.mrb[3].mxu0  ;;  %v222_v3 = vpop.f32.mrb[2].mxu1  ;;  %v265_v7 = vmax.f32 %v164_v58, 0.0 }
  0xe0   :  { %v279_v4 = vmax.f32 %v220_v62, 0.0  ;;  %v223_v5 = vadd.f32 %v1362_v55, %v222_v3  ;;  %v922_v6 = vpop.f32.mrb[3].mxu1 }
  0xe1   :  { %v266_v8 = vmax.f32 %v167_v0, 0.0 }
  0xe2   :  { %v280_v9 = vmax.f32 %v223_v5, 0.0 }
  0xe3   :  { %v290_v10 = vpack.c.bf16 %v266_v8, %v265_v7 }
  0xe4   :  { %v171_v11 = vpop.f32.mrb[4].mxu0  ;;  %v1373_v12 = vpack.c.bf16 %v280_v9, %v279_v4 }
  0xe5   :  { %v172_v13 = vadd.f32 %v1362_v55, %v171_v11  ;;  %v897_v14 = vpop.f32.mrb[5].mxu0  ;;  %960 = vmatmul.mubr.bf16.vlgmr.msra.gmra.mrb[24].mxu1 %v290_v10  ;;  %v227_v15 = vpop.f32.mrb[4].mxu1 }
  0xe6   :  { %v174_v16 = vpop.f32.mrb[6].mxu0  ;;  %963 = vmatprep.mubr.msk.bf16.mxu1 %vm1131_vm0, %v1130_v1  ;;  %v228_v17 = vadd.f32 %v1362_v55, %v227_v15  ;;  %v925_v18 = vpop.f32.mrb[5].mxu1 }
  0xe7   :  { %v175_v19 = vadd.f32 %v1362_v55, %v174_v16  ;;  %v898_v20 = vpop.f32.mrb[7].mxu0  ;;  %v230_v21 = vpop.f32.mrb[6].mxu1  ;;  %v267_v25 = vmax.f32 %v172_v13, 0.0 }
  0xe8   :  { %v281_v22 = vmax.f32 %v228_v17, 0.0  ;;  %v231_v23 = vadd.f32 %v1362_v55, %v230_v21  ;;  %v926_v24 = vpop.f32.mrb[7].mxu1 }
  0xe9   :  { %v268_v26 = vmax.f32 %v175_v19, 0.0 }
  0xea   :  { %v282_v27 = vmax.f32 %v231_v23, 0.0 }
  0xeb   :  { %v291_v28 = vpack.c.bf16 %v268_v26, %v267_v25 }
  0xec   :  { %v179_v29 = vpop.f32.mrb[8].mxu0  ;;  %v1381_v30 = vpack.c.bf16 %v282_v27, %v281_v22 }
  0xed   :  { %v180_v31 = vadd.f32 %v1362_v55, %v179_v29  ;;  %v901_v32 = vpop.f32.mrb[9].mxu0  ;;  %964 = vmatmul.mubr.bf16.gmra.mrb[28].mxu1 %v291_v28  ;;  %v235_v33 = vpop.f32.mrb[8].mxu1 }
  0xee   :  { %v182_v34 = vpop.f32.mrb[10].mxu0  ;;  %967 = vmatprep.mubr.msk.bf16.mxu1 %vm1131_vm0, %v1130_v1  ;;  %v236_v35 = vadd.f32 %v1362_v55, %v235_v33  ;;  %v929_v36 = vpop.f32.mrb[9].mxu1 }
  0xef   :  { %v183_v37 = vadd.f32 %v1362_v55, %v182_v34  ;;  %v902_v38 = vpop.f32.mrb[11].mxu0  ;;  %v238_v39 = vpop.f32.mrb[10].mxu1  ;;  %v269_v43 = vmax.f32 %v180_v31, 0.0 }
  0xf0   :  { %v283_v40 = vmax.f32 %v236_v35, 0.0  ;;  %v239_v41 = vadd.f32 %v1362_v55, %v238_v39  ;;  %v930_v42 = vpop.f32.mrb[11].mxu1 }
  0xf1   :  { %v270_v44 = vmax.f32 %v183_v37, 0.0 }
  0xf2   :  { %v284_v45 = vmax.f32 %v239_v41, 0.0 }
  0xf3   :  { %v292_v46 = vpack.c.bf16 %v270_v44, %v269_v43 }
  0xf4   :  { %v187_v47 = vpop.f32.mrb[12].mxu0  ;;  %v1389_v48 = vpack.c.bf16 %v284_v45, %v283_v40 }
  0xf5   :  { %v188_v49 = vadd.f32 %v1362_v55, %v187_v47  ;;  %v905_v50 = vpop.f32.mrb[13].mxu0  ;;  %968 = vmatmul.mubr.bf16.gmra.mrb[32].mxu1 %v292_v46  ;;  %v243_v51 = vpop.f32.mrb[12].mxu1  ;;  %v1433_v47 = vld [vmem:[%s1530_s4] ss:$0 sm:$0xff] }
  0xf6   :  { %v190_v52 = vpop.f32.mrb[14].mxu0  ;;  %971 = vmatprep.mubr.msk.bf16.mxu1 %vm1131_vm0, %v1130_v1  ;;  %v244_v53 = vadd.f32 %v1362_v55, %v243_v51  ;;  %v933_v54 = vpop.f32.mrb[13].mxu1 }
  0xf7   :  { %v191_v56 = vadd.f32 %v1362_v55, %v190_v52  ;;  %v906_v57 = vpop.f32.mrb[15].mxu0  ;;  %v246_v58 = vpop.f32.mrb[14].mxu1  ;;  %v271_v62 = vmax.f32 %v188_v49, 0.0 }
  0xf8   :  { %v285_v59 = vmax.f32 %v244_v53, 0.0  ;;  %v247_v60 = vadd.f32 %v1362_v55, %v246_v58  ;;  %v934_v61 = vpop.f32.mrb[15].mxu1 }
  0xf9   :  { %v272_v63 = vmax.f32 %v191_v56, 0.0 }
  0xfa   :  { %v286_v0 = vmax.f32 %v247_v60, 0.0 }
  0xfb   :  { %v293_v2 = vpack.c.bf16 %v272_v63, %v271_v62 }
  0xfc   :  { %v195_v3 = vpop.f32.mrb[16].mxu0  ;;  %v300_v4 = vpack.c.bf16 %v286_v0, %v285_v59 }
  0xfd   :  { %v196_v5 = vadd.f32 %v1362_v55, %v195_v3  ;;  %v909_v6 = vpop.f32.mrb[17].mxu0  ;;  %972 = vmatmul.mubr.bf16.gmra.mrb[36].mxu1 %v293_v2  ;;  %v251_v7 = vpop.f32.mrb[16].mxu1 }
  0xfe   :  { %v198_v8 = vpop.f32.mrb[18].mxu0  ;;  %975 = vmatprep.mubr.msk.bf16.mxu1 %vm1131_vm0, %v1130_v1  ;;  %v252_v9 = vadd.f32 %v1362_v55, %v251_v7  ;;  %v937_v10 = vpop.f32.mrb[17].mxu1 }
  0xff   :  { %v199_v11 = vadd.f32 %v1362_v55, %v198_v8  ;;  %v910_v13 = vpop.f32.mrb[19].mxu0  ;;  %v254_v14 = vpop.f32.mrb[18].mxu1  ;;  %v273_v18 = vmax.f32 %v196_v5, 0.0 }
 0x100   :  { %v287_v15 = vmax.f32 %v252_v9, 0.0  ;;  %v255_v16 = vadd.f32 %v1362_v55, %v254_v14  ;;  %v938_v17 = vpop.f32.mrb[19].mxu1 }
 0x101   :  { %v274_v19 = vmax.f32 %v199_v11, 0.0 }
 0x102   :  { %v288_v20 = vmax.f32 %v255_v16, 0.0 }
 0x103   :  { %v294_v21 = vpack.c.bf16 %v274_v19, %v273_v18 }
 0x104   :  { %v203_v22 = vpop.f32.mrb[20].mxu0  ;;  %v301_v23 = vpack.c.bf16 %v288_v20, %v287_v15 }
 0x105   :  { %v204_v24 = vadd.f32 %v1362_v55, %v203_v22  ;;  %v913_v25 = vpop.f32.mrb[21].mxu0  ;;  %976 = vmatmul.mubr.bf16.gmra.mrb[40].mxu1 %v294_v21  ;;  %v259_v26 = vpop.f32.mrb[20].mxu1 }
 0x106   :  { %v206_v27 = vpop.f32.mrb[22].mxu0  ;;  %979 = vmatprep.mubr.msk.bf16.mxu1 %vm1131_vm0, %v1130_v1  ;;  %v260_v28 = vadd.f32 %v1362_v55, %v259_v26  ;;  %v941_v29 = vpop.f32.mrb[21].mxu1 }
 0x107   :  { %v207_v31 = vadd.f32 %v1362_v55, %v206_v27  ;;  %v914_v32 = vpop.f32.mrb[23].mxu0  ;;  %v262_v33 = vpop.f32.mrb[22].mxu1  ;;  %v275_v35 = vmax.f32 %v204_v24, 0.0 }
 0x108   :  { %v942_v34 = vpop.f32.mrb[23].mxu1 }
 0x109   :  { %v276_v36 = vmax.f32 %v207_v31, 0.0 }
 0x10b   :  { %v295_v37 = vpack.c.bf16 %v276_v36, %v275_v35 }
 0x10c   :  { %v211_v38 = vpop.f32.mrb[24].mxu0 }
 0x10d   :  { %v212_v39 = vadd.f32 %v1362_v55, %v211_v38  ;;  %v917_v40 = vpop.f32.mrb[25].mxu0  ;;  %980 = vmatmul.mubr.bf16.gmra.mrb[44].mxu1 %v295_v37 }
 0x10e   :  { %v214_v41 = vpop.f32.mrb[26].mxu0  ;;  %983 = vmatprep.mubr.msk.bf16.mxu1 %vm1131_vm0, %v1130_v1 }
 0x10f   :  { %v215_v42 = vadd.f32 %v1362_v55, %v214_v41  ;;  %v918_v43 = vpop.f32.mrb[27].mxu0  ;;  %v277_v44 = vmax.f32 %v212_v39, 0.0  ;;  %v1105_v55 = vld [vmem:[%s1531_s5 + $0x38] sm:$0xff]  }
 0x110   :  { %1026 = vmatpush3.bf16.msra.mxu0 %v1105_v55 }
 0x111   :  { %v278_v45 = vmax.f32 %v215_v42, 0.0 }
 0x113   :  { %v296_v46 = vpack.c.bf16 %v278_v45, %v277_v44 }
 0x115   :  { %984 = vmatmul.mubr.bf16.gmra.mrb[48].mxu1 %v296_v46 }
 0x116   :  { %987 = vmatprep.mubr.msk.bf16.mxu1 %vm1131_vm0, %v1130_v1 }
 0x11d   :  { %988 = vmatmul.mubr.bf16.gmra.mrb[52].mxu1 %v1373_v12  ;;  %v289_v12 = vmax.f32 %v260_v28, 0.0 }
 0x11e   :  { %991 = vmatprep.mubr.msk.bf16.mxu1 %vm1131_vm0, %v1130_v1 }
 0x125   :  { %992 = vmatmul.mubr.bf16.gmra.mrb[56].mxu1 %v1381_v30  ;;  %v302_v30 = vpack.c.bf16 %v289_v12, %v289_v12 }
 0x126   :  { %995 = vmatprep.mubr.msk.bf16.mxu1 %vm1131_vm0, %v1130_v1 }
 0x12d   :  { %996 = vmatmul.mubr.bf16.gmra.mrb[60].mxu1 %v1389_v48 }
 0x12e   :  { %999 = vmatprep.mubr.msk.bf16.mxu1 %vm1131_vm0, %v1130_v1 }
 0x135   :  { %1000 = vmatmul.mubr.bf16.gmra.mrb[64].mxu1 %v300_v4 }
 0x136   :  { %1003 = vmatprep.mubr.msk.bf16.mxu1 %vm1131_vm0, %v1130_v1 }
 0x13d   :  { %1004 = vmatmul.mubr.bf16.gmra.mrb[68].mxu1 %v301_v23 }
 0x13e   :  { %1007 = vmatprep.mubr.msk.bf16.mxu1 %vm1131_vm0, %v1130_v1 }
 0x145   :  { %1008 = vmatmul.mubr.bf16.gmra.mrb[72].mxu1 %v302_v30 }
 0x1b8   :  { %v408_v48 = vpop.f32.mrb[24].mxu1 }
 0x1b9   :  { %v409_v49 = vadd.f32 %v1433_v47, %v408_v48  ;;  %v961_v50 = vpop.f32.mrb[25].mxu1 }
 0x1ba   :  { %v411_v51 = vpop.f32.mrb[26].mxu1 }
 0x1bb   :  { %v412_v52 = vadd.f32 %v1433_v47, %v411_v51  ;;  %v962_v53 = vpop.f32.mrb[27].mxu1  ;;  %v510_v54 = vmax.f32 %v409_v49, 0.0 }
 0x1bd   :  { %v511_v56 = vmax.f32 %v412_v52, 0.0 }
 0x1bf   :  { %v535_v57 = vpack.c.bf16 %v511_v56, %v510_v54 }
 0x1c0   :  { %v416_v58 = vpop.f32.mrb[28].mxu1 }
 0x1c1   :  { %v417_v59 = vadd.f32 %v1433_v47, %v416_v58  ;;  %v965_v60 = vpop.f32.mrb[29].mxu1  ;;  %1028 = vmatmul.mubr.bf16.vlgmr.msra.gmra.mrb[28].mxu0 %v535_v57 }
 0x1c2   :  { %v419_v61 = vpop.f32.mrb[30].mxu1  ;;  %1031 = vmatprep.mubr.msk.bf16.mxu0 %vm1131_vm0, %v1130_v1 }
 0x1c3   :  { %v420_v62 = vadd.f32 %v1433_v47, %v419_v61  ;;  %v966_v63 = vpop.f32.mrb[31].mxu1  ;;  %v512_v0 = vmax.f32 %v417_v59, 0.0 }
 0x1c5   :  { %v513_v2 = vmax.f32 %v420_v62, 0.0 }
 0x1c7   :  { %v536_v3 = vpack.c.bf16 %v513_v2, %v512_v0 }
 0x1c8   :  { %v424_v4 = vpop.f32.mrb[32].mxu1 }
 0x1c9   :  { %v425_v5 = vadd.f32 %v1433_v47, %v424_v4  ;;  %v969_v6 = vpop.f32.mrb[33].mxu1  ;;  %1032 = vmatmul.mubr.bf16.gmra.mrb[32].mxu0 %v536_v3 }
 0x1ca   :  { %v427_v7 = vpop.f32.mrb[34].mxu1  ;;  %1035 = vmatprep.mubr.msk.bf16.mxu0 %vm1131_vm0, %v1130_v1 }
 0x1cb   :  { %v428_v8 = vadd.f32 %v1433_v47, %v427_v7  ;;  %v970_v9 = vpop.f32.mrb[35].mxu1  ;;  %v514_v10 = vmax.f32 %v425_v5, 0.0 }
 0x1cd   :  { %v515_v11 = vmax.f32 %v428_v8, 0.0 }
 0x1cf   :  { %v537_v13 = vpack.c.bf16 %v515_v11, %v514_v10 }
 0x1d0   :  { %v432_v14 = vpop.f32.mrb[36].mxu1 }
 0x1d1   :  { %v433_v15 = vadd.f32 %v1433_v47, %v432_v14  ;;  %v973_v16 = vpop.f32.mrb[37].mxu1  ;;  %1036 = vmatmul.mubr.bf16.gmra.mrb[36].mxu0 %v537_v13 }
 0x1d2   :  { %v435_v17 = vpop.f32.mrb[38].mxu1  ;;  %1039 = vmatprep.mubr.msk.bf16.mxu0 %vm1131_vm0, %v1130_v1 }
 0x1d3   :  { %v436_v18 = vadd.f32 %v1433_v47, %v435_v17  ;;  %v974_v19 = vpop.f32.mrb[39].mxu1  ;;  %v516_v20 = vmax.f32 %v433_v15, 0.0 }
 0x1d5   :  { %v517_v21 = vmax.f32 %v436_v18, 0.0 }
 0x1d7   :  { %v538_v22 = vpack.c.bf16 %v517_v21, %v516_v20 }
 0x1d8   :  { %v440_v23 = vpop.f32.mrb[40].mxu1 }
 0x1d9   :  { %v441_v24 = vadd.f32 %v1433_v47, %v440_v23  ;;  %v977_v25 = vpop.f32.mrb[41].mxu1  ;;  %1040 = vmatmul.mubr.bf16.gmra.mrb[40].mxu0 %v538_v22 }
 0x1da   :  { %v443_v26 = vpop.f32.mrb[42].mxu1  ;;  %1043 = vmatprep.mubr.msk.bf16.mxu0 %vm1131_vm0, %v1130_v1 }
 0x1db   :  { %v444_v27 = vadd.f32 %v1433_v47, %v443_v26  ;;  %v978_v28 = vpop.f32.mrb[43].mxu1  ;;  %v518_v29 = vmax.f32 %v441_v24, 0.0 }
 0x1dd   :  { %v519_v31 = vmax.f32 %v444_v27, 0.0 }
 0x1df   :  { %v539_v32 = vpack.c.bf16 %v519_v31, %v518_v29 }
 0x1e0   :  { %v448_v33 = vpop.f32.mrb[44].mxu1 }
 0x1e1   :  { %v449_v34 = vadd.f32 %v1433_v47, %v448_v33  ;;  %v981_v35 = vpop.f32.mrb[45].mxu1  ;;  %1044 = vmatmul.mubr.bf16.gmra.mrb[44].mxu0 %v539_v32 }
 0x1e2   :  { %v451_v36 = vpop.f32.mrb[46].mxu1  ;;  %1047 = vmatprep.mubr.msk.bf16.mxu0 %vm1131_vm0, %v1130_v1 }
 0x1e3   :  { %v452_v37 = vadd.f32 %v1433_v47, %v451_v36  ;;  %v982_v38 = vpop.f32.mrb[47].mxu1  ;;  %v520_v39 = vmax.f32 %v449_v34, 0.0 }
 0x1e5   :  { %v521_v40 = vmax.f32 %v452_v37, 0.0 }
 0x1e7   :  { %v540_v41 = vpack.c.bf16 %v521_v40, %v520_v39 }
 0x1e8   :  { %v456_v42 = vpop.f32.mrb[48].mxu1 }
 0x1e9   :  { %v457_v43 = vadd.f32 %v1433_v47, %v456_v42  ;;  %v985_v44 = vpop.f32.mrb[49].mxu1  ;;  %1048 = vmatmul.mubr.bf16.gmra.mrb[48].mxu0 %v540_v41  ;;  %v1487_v41 = vld [vmem:[%s1532_s6] ss:$0 sm:$0xff]  ;;  %s1132_s6 = smov [#allocation2]  }
 0x1ea   :  { %v459_v45 = vpop.f32.mrb[50].mxu1  ;;  %1051 = vmatprep.mubr.msk.bf16.mxu0 %vm1131_vm0, %v1130_v1  ;;  %s785_s15 = sshll.u32 %s1132_s6, 4  ;;  %s786_s15 = int_to_ptr.vmem [resolvable:$true] %s785_s15 }
 0x1eb   :  { %v460_v46 = vadd.f32 %v1433_v47, %v459_v45  ;;  %v986_v55 = vpop.f32.mrb[51].mxu1  ;;  %v522_v12 = vmax.f32 %v457_v43, 0.0  ;;  %s1106_s16 = scalar_lea.vmem %s786_s15, 3200  ;;  %p1111_p1 = scmp.lt.s32.totalorder %s786_s15, %s786_s15 }
 0x1ec   :  { %p1107_p0 = scmp.ne.s32.totalorder %s786_s15, %s1106_s16  ;;  %p1112_p2 = scmp.lt.s32.totalorder %s1106_s16, %s1106_s16 }
 0x1ed   :  { %v523_v30 = vmax.f32 %v460_v46, 0.0 }
 0x1ee   :  { %p1113_p3 = por %p1112_p2, %p1111_p1 }
 0x1ef   :  { %v541_v48 = vpack.c.bf16 %v523_v30, %v522_v12 }
 0x1f0   :  { %v464_v49 = vpop.f32.mrb[52].mxu1  ;;  %p1114_p4 = pnand %p1113_p3, %p1107_p0 }
 0x1f1   :  { %v465_v50 = vadd.f32 %v1433_v47, %v464_v49  ;;  %v989_v51 = vpop.f32.mrb[53].mxu1  ;;  %1052 = vmatmul.mubr.bf16.gmra.mrb[52].mxu0 %v541_v48 }
 0x1f2   :  { %v467_v52 = vpop.f32.mrb[54].mxu1  ;;  %1055 = vmatprep.mubr.msk.bf16.mxu0 %vm1131_vm0, %v1130_v1 }
 0x1f3   :  { %v468_v53 = vadd.f32 %v1433_v47, %v467_v52  ;;  %v990_v54 = vpop.f32.mrb[55].mxu1  ;;  %v524_v56 = vmax.f32 %v465_v50, 0.0 }
 0x1f5   :  { %v525_v57 = vmax.f32 %v468_v53, 0.0 }
 0x1f7   :  { %v542_v58 = vpack.c.bf16 %v525_v57, %v524_v56 }
 0x1f8   :  { %v472_v59 = vpop.f32.mrb[56].mxu1 }
 0x1f9   :  { %v473_v60 = vadd.f32 %v1433_v47, %v472_v59  ;;  %v993_v61 = vpop.f32.mrb[57].mxu1  ;;  %1056 = vmatmul.mubr.bf16.gmra.mrb[56].mxu0 %v542_v58 }
 0x1fa   :  { %v475_v62 = vpop.f32.mrb[58].mxu1  ;;  %1059 = vmatprep.mubr.msk.bf16.mxu0 %vm1131_vm0, %v1130_v1 }
 0x1fb   :  { %v476_v63 = vadd.f32 %v1433_v47, %v475_v62  ;;  %v994_v0 = vpop.f32.mrb[59].mxu1  ;;  %v526_v2 = vmax.f32 %v473_v60, 0.0 }
 0x1fd   :  { %v527_v3 = vmax.f32 %v476_v63, 0.0 }
 0x1ff   :  { %v543_v4 = vpack.c.bf16 %v527_v3, %v526_v2 }
 0x200   :  { %v480_v5 = vpop.f32.mrb[60].mxu1 }
 0x201   :  { %v481_v6 = vadd.f32 %v1433_v47, %v480_v5  ;;  %v997_v7 = vpop.f32.mrb[61].mxu1  ;;  %1060 = vmatmul.mubr.bf16.gmra.mrb[60].mxu0 %v543_v4 }
 0x202   :  { %v483_v8 = vpop.f32.mrb[62].mxu1  ;;  %1063 = vmatprep.mubr.msk.bf16.mxu0 %vm1131_vm0, %v1130_v1 }
 0x203   :  { %v484_v9 = vadd.f32 %v1433_v47, %v483_v8  ;;  %v998_v10 = vpop.f32.mrb[63].mxu1  ;;  %v528_v11 = vmax.f32 %v481_v6, 0.0 }
 0x205   :  { %v529_v13 = vmax.f32 %v484_v9, 0.0 }
 0x207   :  { %v544_v14 = vpack.c.bf16 %v529_v13, %v528_v11 }
 0x208   :  { %v488_v15 = vpop.f32.mrb[64].mxu1 }
 0x209   :  { %v489_v16 = vadd.f32 %v1433_v47, %v488_v15  ;;  %v1001_v17 = vpop.f32.mrb[65].mxu1  ;;  %1064 = vmatmul.mubr.bf16.gmra.mrb[64].mxu0 %v544_v14 }
 0x20a   :  { %v491_v18 = vpop.f32.mrb[66].mxu1  ;;  %1067 = vmatprep.mubr.msk.bf16.mxu0 %vm1131_vm0, %v1130_v1 }
 0x20b   :  { %v492_v19 = vadd.f32 %v1433_v47, %v491_v18  ;;  %v1002_v20 = vpop.f32.mrb[67].mxu1  ;;  %v530_v21 = vmax.f32 %v489_v16, 0.0 }
 0x20d   :  { %v531_v22 = vmax.f32 %v492_v19, 0.0 }
 0x20f   :  { %v545_v23 = vpack.c.bf16 %v531_v22, %v530_v21 }
 0x210   :  { %v496_v24 = vpop.f32.mrb[68].mxu1 }
 0x211   :  { %v497_v25 = vadd.f32 %v1433_v47, %v496_v24  ;;  %v1005_v26 = vpop.f32.mrb[69].mxu1  ;;  %1068 = vmatmul.mubr.bf16.gmra.mrb[68].mxu0 %v545_v23 }
 0x212   :  { %v499_v27 = vpop.f32.mrb[70].mxu1  ;;  %1071 = vmatprep.mubr.msk.bf16.mxu0 %vm1131_vm0, %v1130_v1 }
 0x213   :  { %v500_v28 = vadd.f32 %v1433_v47, %v499_v27  ;;  %v1006_v29 = vpop.f32.mrb[71].mxu1  ;;  %v532_v31 = vmax.f32 %v497_v25, 0.0 }
 0x215   :  { %v533_v32 = vmax.f32 %v500_v28, 0.0 }
 0x217   :  { %v546_v33 = vpack.c.bf16 %v533_v32, %v532_v31 }
 0x218   :  { %v504_v34 = vpop.f32.mrb[72].mxu1 }
 0x219   :  { %v505_v35 = vadd.f32 %v1433_v47, %v504_v34  ;;  %v1009_v36 = vpop.f32.mrb[73].mxu1  ;;  %1072 = vmatmul.mubr.bf16.gmra.mrb[72].mxu0 %v546_v33 }
 0x21a   :  { %v507_v37 = vpop.f32.mrb[74].mxu1  ;;  %1075 = vmatprep.mubr.msk.bf16.mxu0 %vm1131_vm0, %v1130_v1 }
 0x21b   :  { %v534_v38 = vmax.f32 %v505_v35, 0.0  ;;  %v1010_v39 = vpop.f32.mrb[75].mxu1 }
 0x21d   :  { %v547_v40 = vpack.c.bf16 %v534_v38, %v534_v38 }
 0x221   :  { %1076 = vmatmul.mubr.bf16.gmra.mrb[76].mxu0 %v547_v40 }
 0x294   :  { %v653_v42 = vpop.f32.mrb[28].mxu0 }
 0x295   :  { %v654_v43 = vadd.f32 %v1487_v41, %v653_v42  ;;  %v1029_v44 = vpop.f32.mrb[29].mxu0 }
 0x296   :  { %v656_v47 = vpop.f32.mrb[30].mxu0 }
 0x297   :  { %755 = vst [vmem:[#allocation2] sm:$0xff] %v654_v43  ;;  %v657_v45 = vadd.f32 %v1487_v41, %v656_v47  ;;  %v1030_v46 = vpop.f32.mrb[31].mxu0 }
 0x299   :  { %756 = vst [vmem:[#allocation2 + $0x8] sm:$0xff] %v657_v45 }
 0x29c   :  { %v661_v1 = vpop.f32.mrb[32].mxu0 }
 0x29d   :  { %v662_v55 = vadd.f32 %v1487_v41, %v661_v1  ;;  %v1033_v12 = vpop.f32.mrb[33].mxu0 }
 0x29e   :  { %v664_v30 = vpop.f32.mrb[34].mxu0 }
 0x29f   :  { %757 = vst [vmem:[#allocation2 + $0x10] sm:$0xff] %v662_v55  ;;  %v665_v48 = vadd.f32 %v1487_v41, %v664_v30  ;;  %v1034_v49 = vpop.f32.mrb[35].mxu0 }
 0x2a1   :  { %758 = vst [vmem:[#allocation2 + $0x18] sm:$0xff] %v665_v48 }
 0x2a4   :  { %v669_v50 = vpop.f32.mrb[36].mxu0 }
 0x2a5   :  { %v670_v51 = vadd.f32 %v1487_v41, %v669_v50  ;;  %v1037_v52 = vpop.f32.mrb[37].mxu0 }
 0x2a6   :  { %v672_v53 = vpop.f32.mrb[38].mxu0 }
 0x2a7   :  { %759 = vst [vmem:[#allocation2 + $0x20] sm:$0xff] %v670_v51  ;;  %v673_v54 = vadd.f32 %v1487_v41, %v672_v53  ;;  %v1038_v56 = vpop.f32.mrb[39].mxu0 }
 0x2a9   :  { %760 = vst [vmem:[#allocation2 + $0x28] sm:$0xff] %v673_v54 }
 0x2ac   :  { %v677_v57 = vpop.f32.mrb[40].mxu0 }
 0x2ad   :  { %v678_v58 = vadd.f32 %v1487_v41, %v677_v57  ;;  %v1041_v59 = vpop.f32.mrb[41].mxu0 }
 0x2ae   :  { %v680_v60 = vpop.f32.mrb[42].mxu0 }
 0x2af   :  { %761 = vst [vmem:[#allocation2 + $0x30] sm:$0xff] %v678_v58  ;;  %v681_v61 = vadd.f32 %v1487_v41, %v680_v60  ;;  %v1042_v62 = vpop.f32.mrb[43].mxu0 }
 0x2b1   :  { %762 = vst [vmem:[#allocation2 + $0x38] sm:$0xff] %v681_v61 }
 0x2b4   :  { %v685_v63 = vpop.f32.mrb[44].mxu0 }
 0x2b5   :  { %v686_v0 = vadd.f32 %v1487_v41, %v685_v63  ;;  %v1045_v2 = vpop.f32.mrb[45].mxu0 }
 0x2b6   :  { %v688_v3 = vpop.f32.mrb[46].mxu0 }
 0x2b7   :  { %763 = vst [vmem:[#allocation2 + $0x40] sm:$0xff] %v686_v0  ;;  %v689_v4 = vadd.f32 %v1487_v41, %v688_v3  ;;  %v1046_v5 = vpop.f32.mrb[47].mxu0 }
 0x2b9   :  { %764 = vst [vmem:[#allocation2 + $0x48] sm:$0xff] %v689_v4 }
 0x2bc   :  { %v693_v6 = vpop.f32.mrb[48].mxu0 }
 0x2bd   :  { %v694_v7 = vadd.f32 %v1487_v41, %v693_v6  ;;  %v1049_v8 = vpop.f32.mrb[49].mxu0 }
 0x2be   :  { %v696_v9 = vpop.f32.mrb[50].mxu0 }
 0x2bf   :  { %765 = vst [vmem:[#allocation2 + $0x50] sm:$0xff] %v694_v7  ;;  %v697_v10 = vadd.f32 %v1487_v41, %v696_v9  ;;  %v1050_v11 = vpop.f32.mrb[51].mxu0 }
 0x2c1   :  { %766 = vst [vmem:[#allocation2 + $0x58] sm:$0xff] %v697_v10 }
 0x2c4   :  { %v701_v13 = vpop.f32.mrb[52].mxu0 }
 0x2c5   :  { %v702_v14 = vadd.f32 %v1487_v41, %v701_v13  ;;  %v1053_v15 = vpop.f32.mrb[53].mxu0 }
 0x2c6   :  { %v704_v16 = vpop.f32.mrb[54].mxu0 }
 0x2c7   :  { %767 = vst [vmem:[#allocation2 + $0x60] sm:$0xff] %v702_v14  ;;  %v705_v17 = vadd.f32 %v1487_v41, %v704_v16  ;;  %v1054_v18 = vpop.f32.mrb[55].mxu0 }
 0x2c9   :  { %768 = vst [vmem:[#allocation2 + $0x68] sm:$0xff] %v705_v17 }
 0x2cc   :  { %v709_v19 = vpop.f32.mrb[56].mxu0 }
 0x2cd   :  { %v710_v20 = vadd.f32 %v1487_v41, %v709_v19  ;;  %v1057_v21 = vpop.f32.mrb[57].mxu0 }
 0x2ce   :  { %v712_v22 = vpop.f32.mrb[58].mxu0 }
 0x2cf   :  { %769 = vst [vmem:[#allocation2 + $0x70] sm:$0xff] %v710_v20  ;;  %v713_v23 = vadd.f32 %v1487_v41, %v712_v22  ;;  %v1058_v24 = vpop.f32.mrb[59].mxu0 }
 0x2d1   :  { %770 = vst [vmem:[#allocation2 + $0x78] sm:$0xff] %v713_v23 }
 0x2d4   :  { %v717_v25 = vpop.f32.mrb[60].mxu0 }
 0x2d5   :  { %v718_v26 = vadd.f32 %v1487_v41, %v717_v25  ;;  %v1061_v27 = vpop.f32.mrb[61].mxu0 }
 0x2d6   :  { %v720_v28 = vpop.f32.mrb[62].mxu0 }
 0x2d7   :  { %771 = vst [vmem:[#allocation2 + $0x80] sm:$0xff] %v718_v26  ;;  %v721_v29 = vadd.f32 %v1487_v41, %v720_v28  ;;  %v1062_v31 = vpop.f32.mrb[63].mxu0 }
 0x2d9   :  { %772 = vst [vmem:[#allocation2 + $0x88] sm:$0xff] %v721_v29 }
 0x2dc   :  { %v725_v32 = vpop.f32.mrb[64].mxu0 }
 0x2dd   :  { %v726_v33 = vadd.f32 %v1487_v41, %v725_v32  ;;  %v1065_v34 = vpop.f32.mrb[65].mxu0 }
 0x2de   :  { %v728_v35 = vpop.f32.mrb[66].mxu0 }
 0x2df   :  { %773 = vst [vmem:[#allocation2 + $0x90] sm:$0xff] %v726_v33  ;;  %v729_v36 = vadd.f32 %v1487_v41, %v728_v35  ;;  %v1066_v37 = vpop.f32.mrb[67].mxu0 }
 0x2e1   :  { %774 = vst [vmem:[#allocation2 + $0x98] sm:$0xff] %v729_v36 }
 0x2e4   :  { %v733_v38 = vpop.f32.mrb[68].mxu0 }
 0x2e5   :  { %v734_v39 = vadd.f32 %v1487_v41, %v733_v38  ;;  %v1069_v40 = vpop.f32.mrb[69].mxu0 }
 0x2e6   :  { %v736_v42 = vpop.f32.mrb[70].mxu0 }
 0x2e7   :  { %775 = vst [vmem:[#allocation2 + $0xa0] sm:$0xff] %v734_v39  ;;  %v737_v43 = vadd.f32 %v1487_v41, %v736_v42  ;;  %v1070_v44 = vpop.f32.mrb[71].mxu0 }
 0x2e9   :  { %776 = vst [vmem:[#allocation2 + $0xa8] sm:$0xff] %v737_v43 }
 0x2ec   :  { %v741_v47 = vpop.f32.mrb[72].mxu0 }
 0x2ed   :  { %v742_v45 = vadd.f32 %v1487_v41, %v741_v47  ;;  %v1073_v46 = vpop.f32.mrb[73].mxu0 }
 0x2ee   :  { %v744_v1 = vpop.f32.mrb[74].mxu0 }
 0x2ef   :  { %777 = vst [vmem:[#allocation2 + $0xb0] sm:$0xff] %v742_v45  ;;  %v745_v55 = vadd.f32 %v1487_v41, %v744_v1  ;;  %v1074_v12 = vpop.f32.mrb[75].mxu0 }
 0x2f1   :  { %778 = vst [vmem:[#allocation2 + $0xb8] sm:$0xff] %v745_v55 }
 0x2f4   :  { %v749_v30 = vpop.f32.mrb[76].mxu0 }
 0x2f5   :  { %v750_v48 = vadd.f32 %v1487_v41, %v749_v30  ;;  %v1077_v49 = vpop.f32.mrb[77].mxu0 }
 0x2f6   :  { %v752_v50 = vpop.f32.mrb[78].mxu0 }
 0x2f7   :  { %779 = vst [vmem:[#allocation2 + $0xc0] sm:$0xff] %v750_v48  ;;  %v1078_v51 = vpop.f32.mrb[79].mxu0 }
 0x2f8   :  { %1117 = shalt.err (!%p1114_p4)
}
 0x2f9   :  { %s1118_s19 = scalar_lea.hbm %s1533_s7, 3200 }
 0x2fa   :  { %p1119_p5 = scmp.ne.s32.totalorder %s1533_s7, %s1118_s19  ;;  %p1122_p6 = scmp.lt.u32.totalorder %s1118_s19, %s1533_s7 }
 0x2fc   :  { %p1124_p7 = pnand %p1122_p6, %p1119_p5 }
 0x2fe   :  { %1127 = shalt.err (!%p1124_p7)
}
 0x2ff   :  { %s1133_s0 = smov 128   ;;  %s1134_s24 = smov 8  }
 0x300   :  { %791 = dma.vmem_to_hbm [thread:$0]  %s786_s15, 3200, %s1533_s7, [#allocation3], %s1133_s0, %s1133_s0, %s1134_s24  }
 0x301   :  { %1128 = dma.done.wait [#allocation3], 3200  }
 0x302   :  { %1129 = vsyncadd [#allocation3], 4294964096 }
 0x303   :  { %795 = vsyncpa [#allocation3], 1 }

</bundles_post_ra>
